<compile_context>
chip_gen: v5e
topology: v5e:2x2
jax: 0.10.0
libtpu: 0.0.40
codegen_flags: <defaults>
</compile_context>

<pallas_src>
import jax
import jax.numpy as jnp
from jax.experimental import pallas as pl
from jax.experimental.pallas import tpu as pltpu

IN_F = 54           # logical input features
OUT_F = 52          # logical output logits
OUT_PAD = 128       # padded output width (unmasked, lane-dense stores)
H1, H2, H3 = 256, 256, 128


def _round_up(x, m):
    return ((x + m - 1) // m) * m


def _mlp_kernel(x_ref,
                w1_ref, b1_ref,
                w2_ref, b2_ref,
                w3_ref, b3_ref,
                w4_ref, b4_ref,
                o_ref):
    # x tile arrives as f32 [TB, 54]; cast to bf16 in VMEM (native MXU input).
    x = x_ref[...].astype(jnp.bfloat16)
    # Layer 1: Linear(54 -> 256) + ReLU  (K=54; Mosaic pads the contraction dim)
    h = jnp.dot(x, w1_ref[...], preferred_element_type=jnp.float32)
    h = jnp.maximum(h + b1_ref[...], 0.0)
    # Layer 2: Linear(256 -> 256) + ReLU
    h = jnp.dot(h.astype(jnp.bfloat16), w2_ref[...],
                preferred_element_type=jnp.float32)
    h = jnp.maximum(h + b2_ref[...], 0.0)
    # Layer 3: Linear(256 -> 128) + ReLU
    h = jnp.dot(h.astype(jnp.bfloat16), w3_ref[...],
                preferred_element_type=jnp.float32)
    h = jnp.maximum(h + b3_ref[...], 0.0)
    # Layer 4: Linear(128 -> 128), cols 52:128 zero-padded, no activation.
    h = jnp.dot(h.astype(jnp.bfloat16), w4_ref[...],
                preferred_element_type=jnp.float32)
    # bf16 writeback: half the store bytes of f32, still lane-dense (128 wide).
    o_ref[...] = (h + b4_ref[...]).astype(o_ref.dtype)


def _prepare_params(params):
    """Pad w4/b4 cols 52->128 with zeros, cast weights to bf16 (biases f32)."""
    w4 = jnp.zeros((H3, OUT_PAD), jnp.float32).at[:, :OUT_F].set(params["w4"])
    b4 = jnp.zeros((1, OUT_PAD), jnp.float32).at[:, :OUT_F].set(params["b4"])
    return (
        params["w1"].astype(jnp.bfloat16), params["b1"].astype(jnp.float32),
        params["w2"].astype(jnp.bfloat16), params["b2"].astype(jnp.float32),
        params["w3"].astype(jnp.bfloat16), params["b3"].astype(jnp.float32),
        w4.astype(jnp.bfloat16), b4,
    )


def _choose_tb(b_pad, max_block_b):
    """Largest multiple of 128 that divides b_pad and is <= max_block_b.
    If that single tile would cover the whole batch, halve it so the grid has
    >= 2 balanced steps (so v7x can use both TensorCores)."""
    tb = 128
    cand = 128
    while cand <= min(b_pad, max_block_b):
        if b_pad % cand == 0:
            tb = cand
        cand += 128
    if tb == b_pad and b_pad >= 256:
        tb = b_pad // 2        # still a multiple of 64 and divides b_pad
    return tb


def card_guesser_forward(x, params, *, max_block_b=1024, return_padded=False):
    """x: [B, 54] float32. params: w1..w4 stored [in, out], b1..b4 [1, out].

    Returns bf16 logits [B, 52]. With return_padded=True, returns the raw
    padded [B_pad, 128] kernel output so downstream ops can consume it without
    an extra slicing pass (padded rows/cols must be ignored by the consumer).
    """
    B = x.shape[0]
    B_pad = _round_up(B, 128)
    TB = _choose_tb(B_pad, max_block_b)
    grid = (B_pad // TB,)

    # Only the batch dim is (maybe) padded; no feature pad / cast in the
    # wrapper — the kernel reads the raw f32 rows and casts in VMEM.
    x_p = x if B_pad == B else jnp.pad(x, ((0, B_pad - B), (0, 0)))

    flat = _prepare_params(params)

    def _resident(shape):
        # Constant index_map -> block stays VMEM-resident across grid steps;
        # a single buffer avoids redundant staging/DMA for invariant blocks.
        return pl.BlockSpec(shape, lambda i: (0, 0),
                            pipeline_mode=pl.Buffered(1))

    in_specs = [
        pl.BlockSpec((TB, IN_F), lambda i: (i, 0)),           # x tile (f32)
        _resident((IN_F, H1)), _resident((1, H1)),            # w1, b1
        _resident((H1, H2)),   _resident((1, H2)),            # w2, b2
        _resident((H2, H3)),   _resident((1, H3)),            # w3, b3
        _resident((H3, OUT_PAD)), _resident((1, OUT_PAD)),    # w4, b4 (padded)
    ]
    out_spec = pl.BlockSpec((TB, OUT_PAD), lambda i: (i, 0))

    flops_per_row = 2 * (IN_F * H1 + H1 * H2 + H2 * H3 + H3 * OUT_PAD)
    weight_bytes = (2 * (IN_F * H1 + H1 * H2 + H2 * H3 + H3 * OUT_PAD)
                    + 4 * (H1 + H2 + H3 + OUT_PAD))
    cost = pl.CostEstimate(
        flops=B_pad * flops_per_row,
        transcendentals=0,
        bytes_accessed=B_pad * (IN_F * 4 + OUT_PAD * 2) + weight_bytes,
    )

    out = pl.pallas_call(
        _mlp_kernel,
        out_shape=jax.ShapeDtypeStruct((B_pad, OUT_PAD), jnp.bfloat16),
        grid=grid,
        in_specs=in_specs,
        out_specs=out_spec,
        cost_estimate=cost,
        compiler_params=pltpu.CompilerParams(
            dimension_semantics=("parallel",)),
    )(x_p, *flat)

    if return_padded:
        return out              # [B_pad, 128] bf16; rows >= B, cols >= 52 are pad
    return out[:B, :OUT_F]


def init_params(key):
    """Deterministic parameter init (PyTorch-Linear-like uniform ranges)."""
    dims = [(IN_F, H1), (H1, H2), (H2, H3), (H3, OUT_F)]
    params = {}
    for i, (fan_in, fan_out) in enumerate(dims, start=1):
        key, kw, kb = jax.random.split(key, 3)
        bound = 1.0 / jnp.sqrt(jnp.float32(fan_in))
        # Stored [in, out] (transposed vs PyTorch's [out, in]) so the kernel
        # can do x @ W directly on the MXU.
        params[f"w{i}"] = jax.random.uniform(
            kw, (fan_in, fan_out), jnp.float32, minval=-bound, maxval=bound)
        params[f"b{i}"] = jax.random.uniform(
            kb, (1, fan_out), jnp.float32, minval=-bound, maxval=bound)
    return params


def reference_forward_f32(x, params):
    """Pure-JAX f32 reference (matches the PyTorch module exactly)."""
    h = jnp.maximum(x @ params["w1"] + params["b1"], 0.0)
    h = jnp.maximum(h @ params["w2"] + params["b2"], 0.0)
    h = jnp.maximum(h @ params["w3"] + params["b3"], 0.0)
    return h @ params["w4"] + params["b4"]


def reference_forward_bf16(x, params):
    """Pure-JAX reference mirroring the kernel's bf16-input / f32-accum dots."""
    def mm(a, w):
        return jnp.dot(a.astype(jnp.bfloat16), w.astype(jnp.bfloat16),
                       preferred_element_type=jnp.float32)
    h = jnp.maximum(mm(x, params["w1"]) + params["b1"], 0.0)
    h = jnp.maximum(mm(h, params["w2"]) + params["b2"], 0.0)
    h = jnp.maximum(mm(h, params["w3"]) + params["b3"], 0.0)
    return mm(h, params["w4"]) + params["b4"]


if __name__ == "__main__":
    key = jax.random.PRNGKey(0)
    key, kx = jax.random.split(key)
    params = init_params(key)

    # Small aligned batch and a 128-unaligned batch (exercises batch padding
    # and the multi-step "parallel" grid).
    for B in (8, 200):
        kx, kb = jax.random.split(kx)
        x = jax.random.normal(kb, (B, IN_F), dtype=jnp.float32)

        out = jax.block_until_ready(card_guesser_forward(x, params))
        assert out.shape == (B, OUT_F), out.shape
        assert out.dtype == jnp.bfloat16, out.dtype

        out_f32 = out.astype(jnp.float32)
        ref_bf16 = reference_forward_bf16(x, params)
        ref_f32 = reference_forward_f32(x, params)

        assert jnp.allclose(out_f32, ref_bf16, atol=2e-2, rtol=2e-2), \
            f"B={B}: mismatch vs bf16-mirrored reference"
        assert jnp.allclose(out_f32, ref_f32, atol=6e-2, rtol=6e-2), \
            f"B={B}: mismatch vs f32 reference"

    print("KERNEL_OK")
</pallas_src>

<mosaic_0001>
module attributes {stable_mosaic.version = 11 : i64} {
  func.func @_mlp_kernel(%arg0: i32, %arg1: memref<128x54xf32, #tpu.memory_space<vmem>>, %arg2: memref<54x256xbf16, #tpu.memory_space<vmem>>, %arg3: memref<1x256xf32, #tpu.memory_space<vmem>>, %arg4: memref<256x256xbf16, #tpu.memory_space<vmem>>, %arg5: memref<1x256xf32, #tpu.memory_space<vmem>>, %arg6: memref<256x128xbf16, #tpu.memory_space<vmem>>, %arg7: memref<1x128xf32, #tpu.memory_space<vmem>>, %arg8: memref<128x128xbf16, #tpu.memory_space<vmem>>, %arg9: memref<1x128xf32, #tpu.memory_space<vmem>>, %arg10: memref<128x128xbf16, #tpu.memory_space<vmem>>) attributes {dimension_semantics = [#tpu.dimension_semantics<parallel>], iteration_bounds = array<i64: 1>, scalar_prefetch = 0 : i64, scratch_operands = 0 : i64, tpu.core_type = #tpu.core_type<tc>, window_params = [{transform_indices = @transform_0, window_bounds = array<i64: 128, 54>}, {pipeline_mode = #tpu.pipeline_mode<synchronous>, transform_indices = @transform_1, window_bounds = array<i64: 54, 256>}, {pipeline_mode = #tpu.pipeline_mode<synchronous>, transform_indices = @transform_2, window_bounds = array<i64: 1, 256>}, {pipeline_mode = #tpu.pipeline_mode<synchronous>, transform_indices = @transform_3, window_bounds = array<i64: 256, 256>}, {pipeline_mode = #tpu.pipeline_mode<synchronous>, transform_indices = @transform_4, window_bounds = array<i64: 1, 256>}, {pipeline_mode = #tpu.pipeline_mode<synchronous>, transform_indices = @transform_5, window_bounds = array<i64: 256, 128>}, {pipeline_mode = #tpu.pipeline_mode<synchronous>, transform_indices = @transform_6, window_bounds = array<i64: 1, 128>}, {pipeline_mode = #tpu.pipeline_mode<synchronous>, transform_indices = @transform_7, window_bounds = array<i64: 128, 128>}, {pipeline_mode = #tpu.pipeline_mode<synchronous>, transform_indices = @transform_8, window_bounds = array<i64: 1, 128>}, {transform_indices = @transform_9, window_bounds = array<i64: 128, 128>}]} {
    %c0 = arith.constant 0 : index
    %c0_0 = arith.constant 0 : index
    %0 = vector.load %arg1[%c0, %c0_0] : memref<128x54xf32, #tpu.memory_space<vmem>>, vector<128x54xf32>
    %1 = arith.truncf %0 : vector<128x54xf32> to vector<128x54xbf16>
    %c0_1 = arith.constant 0 : index
    %c0_2 = arith.constant 0 : index
    %2 = vector.load %arg2[%c0_1, %c0_2] : memref<54x256xbf16, #tpu.memory_space<vmem>>, vector<54x256xbf16>
    %cst = arith.constant dense<0.000000e+00> : vector<128x256xf32>
    %3 = tpu.matmul %1, %2, %cst {dimension_numbers = #tpu.dot_dimension_numbers<[1], [0], [0], [1], [0, 0, 1, 1], [], []>} : vector<128x54xbf16>, vector<54x256xbf16>, vector<128x256xf32> -> vector<128x256xf32>
    %c0_3 = arith.constant 0 : index
    %c0_4 = arith.constant 0 : index
    %4 = vector.load %arg3[%c0_3, %c0_4] : memref<1x256xf32, #tpu.memory_space<vmem>>, vector<1x256xf32>
    %5 = vector.broadcast %4 : vector<1x256xf32> to vector<128x256xf32>
    %6 = arith.addf %3, %5 : vector<128x256xf32>
    %cst_5 = arith.constant 0.000000e+00 : f32
    %7 = vector.broadcast %cst_5 : f32 to vector<128x256xf32>
    %8 = arith.maximumf %6, %7 : vector<128x256xf32>
    %9 = arith.truncf %8 : vector<128x256xf32> to vector<128x256xbf16>
    %c0_6 = arith.constant 0 : index
    %c0_7 = arith.constant 0 : index
    %10 = vector.load %arg4[%c0_6, %c0_7] : memref<256x256xbf16, #tpu.memory_space<vmem>>, vector<256x256xbf16>
    %cst_8 = arith.constant dense<0.000000e+00> : vector<128x256xf32>
    %11 = tpu.matmul %9, %10, %cst_8 {dimension_numbers = #tpu.dot_dimension_numbers<[1], [0], [0], [1], [0, 0, 1, 1], [], []>} : vector<128x256xbf16>, vector<256x256xbf16>, vector<128x256xf32> -> vector<128x256xf32>
    %c0_9 = arith.constant 0 : index
    %c0_10 = arith.constant 0 : index
    %12 = vector.load %arg5[%c0_9, %c0_10] : memref<1x256xf32, #tpu.memory_space<vmem>>, vector<1x256xf32>
    %13 = vector.broadcast %12 : vector<1x256xf32> to vector<128x256xf32>
    %14 = arith.addf %11, %13 : vector<128x256xf32>
    %cst_11 = arith.constant 0.000000e+00 : f32
    %15 = vector.broadcast %cst_11 : f32 to vector<128x256xf32>
    %16 = arith.maximumf %14, %15 : vector<128x256xf32>
    %17 = arith.truncf %16 : vector<128x256xf32> to vector<128x256xbf16>
    %c0_12 = arith.constant 0 : index
    %c0_13 = arith.constant 0 : index
    %18 = vector.load %arg6[%c0_12, %c0_13] : memref<256x128xbf16, #tpu.memory_space<vmem>>, vector<256x128xbf16>
    %cst_14 = arith.constant dense<0.000000e+00> : vector<128x128xf32>
    %19 = tpu.matmul %17, %18, %cst_14 {dimension_numbers = #tpu.dot_dimension_numbers<[1], [0], [0], [1], [0, 0, 1, 1], [], []>} : vector<128x256xbf16>, vector<256x128xbf16>, vector<128x128xf32> -> vector<128x128xf32>
    %c0_15 = arith.constant 0 : index
    %c0_16 = arith.constant 0 : index
    %20 = vector.load %arg7[%c0_15, %c0_16] : memref<1x128xf32, #tpu.memory_space<vmem>>, vector<1x128xf32>
    %21 = vector.broadcast %20 : vector<1x128xf32> to vector<128x128xf32>
    %22 = arith.addf %19, %21 : vector<128x128xf32>
    %cst_17 = arith.constant 0.000000e+00 : f32
    %23 = vector.broadcast %cst_17 : f32 to vector<128x128xf32>
    %24 = arith.maximumf %22, %23 : vector<128x128xf32>
    %25 = arith.truncf %24 : vector<128x128xf32> to vector<128x128xbf16>
    %c0_18 = arith.constant 0 : index
    %c0_19 = arith.constant 0 : index
    %26 = vector.load %arg8[%c0_18, %c0_19] : memref<128x128xbf16, #tpu.memory_space<vmem>>, vector<128x128xbf16>
    %cst_20 = arith.constant dense<0.000000e+00> : vector<128x128xf32>
    %27 = tpu.matmul %25, %26, %cst_20 {dimension_numbers = #tpu.dot_dimension_numbers<[1], [0], [0], [1], [0, 0, 1, 1], [], []>} : vector<128x128xbf16>, vector<128x128xbf16>, vector<128x128xf32> -> vector<128x128xf32>
    %c0_21 = arith.constant 0 : index
    %c0_22 = arith.constant 0 : index
    %28 = vector.load %arg9[%c0_21, %c0_22] : memref<1x128xf32, #tpu.memory_space<vmem>>, vector<1x128xf32>
    %29 = vector.broadcast %28 : vector<1x128xf32> to vector<128x128xf32>
    %30 = arith.addf %27, %29 : vector<128x128xf32>
    %31 = arith.truncf %30 : vector<128x128xf32> to vector<128x128xbf16>
    %c0_23 = arith.constant 0 : index
    %c0_24 = arith.constant 0 : index
    %32 = vector.load %arg10[%c0_23, %c0_24] : memref<128x128xbf16, #tpu.memory_space<vmem>>, vector<128x128xbf16>
    tpu.vector_store %arg10[%c0_23, %c0_24], %31 {strides = array<i32>} : memref<128x128xbf16, #tpu.memory_space<vmem>>, vector<128x128xbf16>,
    return
  }
  func.func @transform_0(%arg0: i32) -> (i32, i32) {
    %c0_i32 = arith.constant 0 : i32
    %c0_i32_0 = arith.constant 0 : i32
    return %arg0, %c0_i32 : i32, i32
  }
  func.func @transform_1(%arg0: i32) -> (i32, i32) {
    %c0_i32 = arith.constant 0 : i32
    %c0_i32_0 = arith.constant 0 : i32
    %c0_i32_1 = arith.constant 0 : i32
    return %c0_i32, %c0_i32_0 : i32, i32
  }
  func.func @transform_2(%arg0: i32) -> (i32, i32) {
    %c0_i32 = arith.constant 0 : i32
    %c0_i32_0 = arith.constant 0 : i32
    %c0_i32_1 = arith.constant 0 : i32
    return %c0_i32, %c0_i32_0 : i32, i32
  }
  func.func @transform_3(%arg0: i32) -> (i32, i32) {
    %c0_i32 = arith.constant 0 : i32
    %c0_i32_0 = arith.constant 0 : i32
    %c0_i32_1 = arith.constant 0 : i32
    return %c0_i32, %c0_i32_0 : i32, i32
  }
  func.func @transform_4(%arg0: i32) -> (i32, i32) {
    %c0_i32 = arith.constant 0 : i32
    %c0_i32_0 = arith.constant 0 : i32
    %c0_i32_1 = arith.constant 0 : i32
    return %c0_i32, %c0_i32_0 : i32, i32
  }
  func.func @transform_5(%arg0: i32) -> (i32, i32) {
    %c0_i32 = arith.constant 0 : i32
    %c0_i32_0 = arith.constant 0 : i32
    %c0_i32_1 = arith.constant 0 : i32
    return %c0_i32, %c0_i32_0 : i32, i32
  }
  func.func @transform_6(%arg0: i32) -> (i32, i32) {
    %c0_i32 = arith.constant 0 : i32
    %c0_i32_0 = arith.constant 0 : i32
    %c0_i32_1 = arith.constant 0 : i32
    return %c0_i32, %c0_i32_0 : i32, i32
  }
  func.func @transform_7(%arg0: i32) -> (i32, i32) {
    %c0_i32 = arith.constant 0 : i32
    %c0_i32_0 = arith.constant 0 : i32
    %c0_i32_1 = arith.constant 0 : i32
    return %c0_i32, %c0_i32_0 : i32, i32
  }
  func.func @transform_8(%arg0: i32) -> (i32, i32) {
    %c0_i32 = arith.constant 0 : i32
    %c0_i32_0 = arith.constant 0 : i32
    %c0_i32_1 = arith.constant 0 : i32
    return %c0_i32, %c0_i32_0 : i32, i32
  }
  func.func @transform_9(%arg0: i32) -> (i32, i32) {
    %c0_i32 = arith.constant 0 : i32
    %c0_i32_0 = arith.constant 0 : i32
    return %arg0, %c0_i32 : i32, i32
  }
}

</mosaic_0001>

<bundles_post_ra>
// kernel: tpu_custom_call.1
= control target key start
LH: loop header
LB: loop body
LE: loop exit
PB: predicated region body
PF: predicated region fallthrough
CT: control target
= control target key end

     0   :  { %14 = vsyncpa [#allocation3], 0  ;;  %s2007_s0 = inlined_call_operand.vmem [shape: f32[128,54], index: 0, kind: input, shape index: {}]   ;;  %s2008_s1 = inlined_call_operand.vmem [shape: bf16[54,256], index: 1, kind: input, shape index: {}]   ;;  %s2009_s2 = inlined_call_operand.vmem [shape: f32[1,256], index: 2, kind: input, shape index: {}]   ;;  %s2010_s3 = inlined_call_operand.hbm [shape: bf16[256,256], index: 3, kind: input, shape index: {}]   ;;  %s2011_s4 = inlined_call_operand.vmem [shape: f32[1,256], index: 4, kind: input, shape index: {}]   ;;  %s2012_s5 = inlined_call_operand.vmem [shape: bf16[256,128], index: 5, kind: input, shape index: {}]   ;;  %s2013_s6 = inlined_call_operand.vmem [shape: f32[1,128], index: 6, kind: input, shape index: {}]   ;;  %s2014_s7 = inlined_call_operand.hbm [shape: bf16[128,128], index: 7, kind: input, shape index: {}]   ;;  %s2015_s8 = inlined_call_operand.vmem [shape: f32[1,128], index: 8, kind: input, shape index: {}]   ;;  %s2016_s9 = inlined_call_operand.hbm [shape: bf16[128,128], index: 9, kind: output, shape index: {}]  }
   0x1   :  { %15 = vsyncpa [#allocation6], 0 }
   0x2   :  { %16 = vsyncpa [#allocation4], 0  ;;  %s27_s11 = sshll.u32 %s2010_s3, 4  ;;  %s1653_s12 = smov [#allocation2]   ;;  %s28_s11 = int_to_ptr.hbm [resolvable:$true] %s27_s11 }
   0x3   :  { %s29_s13 = sshll.u32 %s1653_s12, 4  ;;  %s46_s16 = sshll.u32 %s2014_s7, 4  ;;  %s30_s13 = int_to_ptr.vmem [resolvable:$true] %s29_s13  ;;  %s47_s16 = int_to_ptr.hbm [resolvable:$true] %s46_s16 }
   0x4   :  { %s1654_s17 = smov 128   ;;  %s1655_s18 = smov 8  }
   0x5   :  { %35 = dma.hbm_to_vmem [thread:$0]  %s28_s11, 4096, %s30_s13, [#allocation3], %s1654_s17, %s1654_s17, %s1655_s18  }
   0x6   :  { %s1656_s19 = smov [#allocation5]   ;;  %s1657_s21 = smov 64  }
   0x7   :  { %s48_s20 = sshll.u32 %s1656_s19, 4  ;;  %s1658_s22 = smov 4   ;;  %s49_s20 = int_to_ptr.vmem [resolvable:$true] %s48_s20 }
   0x8   :  { %54 = dma.hbm_to_vmem [thread:$0]  %s47_s16, 1024, %s49_s20, [#allocation6], %s1657_s21, %s1657_s21, %s1658_s22  }
   0x9   :  { %1647 = dma.done.wait [#allocation3], 4096  }
   0xa   :  { %1648 = vsyncadd [#allocation3], 4294963200 }
   0xb   :  { %1649 = dma.done.wait [#allocation6], 1024  }
   0xc   :  { %1650 = vsyncadd [#allocation6], 4294966272  ;;  %v96_v0 = vld [vmem:[%s2008_s1 + $0x30] sm:$0x77]  ;;  %vm163_vm0 = vcmask 1042432   ;;  %v66_v14 = vld [vmem:[%s2007_s0] sm:$0xff] }
   0xd   :  { %v122_v1 = vunpack.c.l.b16 %v96_v0  ;;  %v1199_v3 = vld [vmem:[%s2008_s1 + $0x20] sm:$0xf]  ;;  %v1450_v4 = vld [vmem:[%s2008_s1 + $0x24] sm:$0xf0]  ;;  %v1191_v7 = vld [vmem:[%s2008_s1 + $0x10] sm:$0xf]  ;;  %v123_v9 = vunpack.c.h.b16 %v96_v0 }
   0xe   :  { %v1200_v6 = vor.u32 %v1450_v4, %v1199_v3  ;;  %v1448_v8 = vld [vmem:[%s2008_s1 + $0x14] sm:$0xf0]  ;;  %v1183_v11 = vld [vmem:[%s2008_s1] sm:$0xf]  ;;  %v1446_v12 = vld [vmem:[%s2008_s1 + $0x4] sm:$0xf0] }
   0xf   :  { %v130_v2 = vpack.c.b16 %v122_v1, %v122_v1  ;;  %v1192_v10 = vor.u32 %v1448_v8, %v1191_v7  ;;  %v131_v13 = vpack.c.b16 %v123_v9, %v123_v9  ;;  %v1184_v15 = vor.u32 %v1446_v12, %v1183_v11  ;;  %v67_v16 = vld [vmem:[%s2007_s0 + $0x8] sm:$0xff]  ;;  %v70_v17 = vld [vmem:[%s2007_s0 + $0x20] sm:$0xff]  ;;  %v1447_v25 = vld [vmem:[%s2008_s1 + $0x14] sm:$0xf]  ;;  %s1167_s28 = sshll.u32 %s2016_s9, 4  ;;  %s1168_s28 = int_to_ptr.hbm [resolvable:$true] %s1167_s28 }
  0x10   :  { %v71_v18 = vld [vmem:[%s2007_s0 + $0x28] sm:$0xff]  ;;  %v1449_v20 = vld [vmem:[%s2008_s1 + $0x24] sm:$0xf]  ;;  %v82_v22 = vpack.c.bf16 %v67_v16, %v66_v14  ;;  %vm138_vm1 = vcmask 441344   ;;  %v1193_v26 = vld [vmem:[%s2008_s1 + $0x18] sm:$0xf0] }
  0x11   :  { %v165_v5 = vsel %vm163_vm0, %v130_v2, 0  ;;  %v168_v19 = vsel %vm163_vm0, %v131_v13, 0  ;;  %v1201_v21 = vld [vmem:[%s2008_s1 + $0x28] sm:$0xf0]  ;;  %v84_v23 = vpack.c.bf16 %v71_v18, %v70_v17  ;;  %v1196_v27 = vor.u32 %v1447_v25, %v1193_v26  ;;  %v1445_v28 = vld [vmem:[%s2008_s1 + $0x4] sm:$0xf] }
  0x12   :  { %174 = vmatpush.bf16.msra.mxu0 %v165_v5  ;;  %1554 = vmatpush.bf16.msra.mxu1 %v165_v5  ;;  %v1204_v24 = vor.u32 %v1449_v20, %v1201_v21  ;;  %v1185_v29 = vld [vmem:[%s2008_s1 + $0x8] sm:$0xf0]  ;;  %v68_v31 = vld [vmem:[%s2007_s0 + $0x10] sm:$0xff]  ;;  %v69_v32 = vld [vmem:[%s2007_s0 + $0x18] sm:$0xff] }
  0x13   :  { %1555 = vmatpush.bf16.msra.mxu2 %v165_v5  ;;  %1556 = vmatpush.bf16.msra.mxu3 %v165_v5  ;;  %v1188_v30 = vor.u32 %v1445_v28, %v1185_v29  ;;  %v72_v33 = vld [vmem:[%s2007_s0 + $0x30] sm:$0xff]  ;;  %v73_v34 = vld [vmem:[%s2007_s0 + $0x38] sm:$0xff]  ;;  %v83_v35 = vpack.c.bf16 %v69_v32, %v68_v31  ;;  %v74_v37 = vld [vmem:[%s2007_s0 + $0x40] sm:$0xff] }
  0x14   :  { %v1786_v36 = vpack.c.bf16 %v73_v34, %v72_v33  ;;  %v75_v38 = vld [vmem:[%s2007_s0 + $0x48] sm:$0xff]  ;;  %v1481_v40 = vld [vmem:[#allocation2 + $0xf4] sm:$0xf]  ;;  %v1345_v41 = vld [vmem:[#allocation2 + $0xf8] sm:$0xf0] }
  0x15   :  { %v1797_v39 = vpack.c.bf16 %v75_v38, %v74_v37  ;;  %v1348_v42 = vor.u32 %v1481_v40, %v1345_v41  ;;  %v1479_v43 = vld [vmem:[#allocation2 + $0xe4] sm:$0xf]  ;;  %v1337_v44 = vld [vmem:[#allocation2 + $0xe8] sm:$0xf0]  ;;  %v1477_v46 = vld [vmem:[#allocation2 + $0xd4] sm:$0xf] }
  0x16   :  { %175 = vmatpush.bf16.msra.mxu0 %v1200_v6  ;;  %1557 = vmatpush.bf16.msra.mxu1 %v1200_v6  ;;  %v1340_v45 = vor.u32 %v1479_v43, %v1337_v44  ;;  %v1329_v47 = vld [vmem:[#allocation2 + $0xd8] sm:$0xf0]  ;;  %v76_v48 = vld [vmem:[%s2007_s0 + $0x50] sm:$0xff]  ;;  %v1466_v52 = vld [vmem:[#allocation2 + $0x74] sm:$0xf0] }
  0x17   :  { %1558 = vmatpush.bf16.msra.mxu2 %v1200_v6  ;;  %1559 = vmatpush.bf16.msra.mxu3 %v1200_v6  ;;  %v1332_v49 = vor.u32 %v1477_v46, %v1329_v47  ;;  %v77_v50 = vld [vmem:[%s2007_s0 + $0x58] sm:$0xff]  ;;  %v1279_v51 = vld [vmem:[#allocation2 + $0x70] sm:$0xf]  ;;  %v1465_v55 = vld [vmem:[#allocation2 + $0x74] sm:$0xf] }
  0x18   :  { %v1809_v53 = vpack.c.bf16 %v77_v50, %v76_v48  ;;  %v1280_v54 = vor.u32 %v1466_v52, %v1279_v51  ;;  %v1281_v56 = vld [vmem:[#allocation2 + $0x78] sm:$0xf0]  ;;  %v1271_v58 = vld [vmem:[#allocation2 + $0x60] sm:$0xf]  ;;  %v1464_v59 = vld [vmem:[#allocation2 + $0x64] sm:$0xf0] }
  0x19   :  { %v1284_v57 = vor.u32 %v1465_v55, %v1281_v56  ;;  %v1463_v60 = vld [vmem:[#allocation2 + $0x64] sm:$0xf]  ;;  %v1272_v61 = vor.u32 %v1464_v59, %v1271_v58  ;;  %v1273_v62 = vld [vmem:[#allocation2 + $0x68] sm:$0xf0]  ;;  %v1263_v2 = vld [vmem:[#allocation2 + $0x50] sm:$0xf] }
  0x1a   :  { %176 = vmatpush.bf16.msra.mxu0 %v1192_v10  ;;  %1560 = vmatpush.bf16.msra.mxu1 %v1192_v10  ;;  %v1276_v63 = vor.u32 %v1463_v60, %v1273_v62  ;;  %v1475_v0 = vld [vmem:[#allocation2 + $0xc4] sm:$0xf]  ;;  %v1321_v1 = vld [vmem:[#allocation2 + $0xc8] sm:$0xf0]  ;;  %v1462_v4 = vld [vmem:[#allocation2 + $0x54] sm:$0xf0] }
  0x1b   :  { %1561 = vmatpush.bf16.msra.mxu2 %v1192_v10  ;;  %1562 = vmatpush.bf16.msra.mxu3 %v1192_v10  ;;  %v1324_v3 = vor.u32 %v1475_v0, %v1321_v1  ;;  %v1461_v5 = vld [vmem:[#allocation2 + $0x54] sm:$0xf]  ;;  %v1265_v6 = vld [vmem:[#allocation2 + $0x58] sm:$0xf0]  ;;  %v1264_v7 = vor.u32 %v1462_v4, %v1263_v2  ;;  %v78_v9 = vld [vmem:[%s2007_s0 + $0x60] sm:$0xff] }
  0x1c   :  { %v1268_v8 = vor.u32 %v1461_v5, %v1265_v6  ;;  %v79_v10 = vld [vmem:[%s2007_s0 + $0x68] sm:$0xff]  ;;  %v1255_v11 = vld [vmem:[#allocation2 + $0x40] sm:$0xf]  ;;  %v1459_v14 = vld [vmem:[#allocation2 + $0x44] sm:$0xf] }
  0x1d   :  { %v1820_v12 = vpack.c.bf16 %v79_v10, %v78_v9  ;;  %v1460_v13 = vld [vmem:[#allocation2 + $0x44] sm:$0xf0]  ;;  %v1247_v18 = vld [vmem:[#allocation2 + $0x30] sm:$0xf]  ;;  %v1457_v20 = vld [vmem:[#allocation2 + $0x34] sm:$0xf] }
  0x1e   :  { %177 = vmatpush.bf16.msra.mxu0 %v1184_v15  ;;  %1563 = vmatpush.bf16.msra.mxu1 %v1184_v15  ;;  %v1256_v16 = vor.u32 %v1460_v13, %v1255_v11  ;;  %v1456_v25 = vld [vmem:[#allocation2 + $0x24] sm:$0xf0]  ;;  %v1455_v26 = vld [vmem:[#allocation2 + $0x24] sm:$0xf]  ;;  %v1241_v28 = vld [vmem:[#allocation2 + $0x28] sm:$0xf0] }
  0x1f   :  { %1564 = vmatpush.bf16.msra.mxu2 %v1184_v15  ;;  %1565 = vmatpush.bf16.msra.mxu3 %v1184_v15  ;;  %v1257_v15 = vld [vmem:[#allocation2 + $0x48] sm:$0xf0]  ;;  %v1244_v29 = vor.u32 %v1455_v26, %v1241_v28  ;;  %v1313_v31 = vld [vmem:[#allocation2 + $0xb8] sm:$0xf0]  ;;  %v1231_v33 = vld [vmem:[#allocation2 + $0x10] sm:$0xf] }
  0x20   :  { %v1260_v17 = vor.u32 %v1459_v14, %v1257_v15  ;;  %v1454_v34 = vld [vmem:[#allocation2 + $0x14] sm:$0xf0]  ;;  %v1233_v38 = vld [vmem:[#allocation2 + $0x18] sm:$0xf0]  ;;  %v80_v41 = vld [vmem:[%s2007_s0 + $0x70] sm:$0xff] }
  0x21   :  { %1205 = vmatmul.msk.bf16.vlgmr.msra.gmra.mxu0 %vm138_vm1, %v82_v22  ;;  %1207 = vmatmul.msk.bf16.vlgmr.msra.gmra.mxu1 %vm138_vm1, %v84_v23  ;;  %v1232_v37 = vor.u32 %v1454_v34, %v1231_v33  ;;  %v1223_v43 = vld [vmem:[#allocation2] sm:$0xf]  ;;  %v1452_v44 = vld [vmem:[#allocation2 + $0x4] sm:$0xf0]  ;;  %v1225_v47 = vld [vmem:[#allocation2 + $0x8] sm:$0xf0] }
  0x22   :  { %223 = vmatpush.bf16.msrb.mxu1 %v168_v19  ;;  %1210 = vmatmul.msk.bf16.vlgmr.msra.gmra.mxu2 %vm138_vm1, %v1809_v53  ;;  %v1458_v19 = vld [vmem:[#allocation2 + $0x34] sm:$0xf0]  ;;  %v1224_v46 = vor.u32 %v1452_v44, %v1223_v43  ;;  %v1305_v50 = vld [vmem:[#allocation2 + $0xa8] sm:$0xf0]  ;;  %v1343_v52 = vld [vmem:[#allocation2 + $0xf0] sm:$0xf] }
  0x23   :  { %514 = vmatpush.bf16.msrb.mxu2 %v1280_v54  ;;  %612 = vmatpush.bf16.msrb.mxu0 %v1284_v57  ;;  %v1248_v21 = vor.u32 %v1458_v19, %v1247_v18  ;;  %v1482_v54 = vld [vmem:[#allocation2 + $0xf4] sm:$0xf0]  ;;  %v1841_v56 = vld [vmem:[%s2009_s2] sm:$0x3]  ;;  %v1480_v60 = vld [vmem:[#allocation2 + $0xe4] sm:$0xf0] }
  0x24   :  { %v1344_v55 = vor.u32 %v1482_v54, %v1343_v52  ;;  %v1335_v59 = vld [vmem:[#allocation2 + $0xe0] sm:$0xf]  ;;  %v1469_v62 = vld [vmem:[#allocation2 + $0x94] sm:$0xf]  ;;  %v1327_v2 = vld [vmem:[#allocation2 + $0xd0] sm:$0xf] }
  0x25   :  { %v1319_v9 = vld [vmem:[#allocation2 + $0xc0] sm:$0xf]  ;;  %v1476_v10 = vld [vmem:[#allocation2 + $0xc4] sm:$0xf0]  ;;  %v1311_v14 = vld [vmem:[#allocation2 + $0xb0] sm:$0xf] }
  0x26   :  { %224 = vmatpush.bf16.msrb.mxu1 %v1204_v24  ;;  %v1239_v24 = vld [vmem:[#allocation2 + $0x20] sm:$0xf]  ;;  %563 = vmatpush.bf16.msrb.mxu3 %v1344_v55  ;;  %v1320_v11 = vor.u32 %v1476_v10, %v1319_v9  ;;  %v1474_v15 = vld [vmem:[#allocation2 + $0xb4] sm:$0xf0]  ;;  %v1295_v26 = vld [vmem:[#allocation2 + $0x90] sm:$0xf] }
  0x27   :  { %515 = vmatpush.bf16.msrb.mxu2 %v1272_v61  ;;  %613 = vmatpush.bf16.msrb.mxu0 %v1276_v63  ;;  %v1336_v61 = vor.u32 %v1480_v60, %v1335_v59  ;;  %v1297_v63 = vld [vmem:[#allocation2 + $0x98] sm:$0xf0]  ;;  %v1303_v19 = vld [vmem:[#allocation2 + $0xa0] sm:$0xf]  ;;  %v1468_v34 = vld [vmem:[#allocation2 + $0x84] sm:$0xf0] }
  0x28   :  { %v1300_v0 = vor.u32 %v1469_v62, %v1297_v63  ;;  %v1287_v33 = vld [vmem:[#allocation2 + $0x80] sm:$0xf]  ;;  %v1489_v62 = vld [vmem:[%s2012_s5 + $0x30] sm:$0xff] }
  0x29   :  { %v1497_v63 = vld [vmem:[%s2012_s5 + $0x70] sm:$0xff] }
  0x2a   :  { %225 = vmatpush.bf16.msrb.mxu1 %v1196_v27  ;;  %v1240_v27 = vor.u32 %v1456_v25, %v1239_v24  ;;  %564 = vmatpush.bf16.msrb.mxu3 %v1336_v61 }
  0x2b   :  { %516 = vmatpush.bf16.msrb.mxu2 %v1264_v7  ;;  %614 = vmatpush.bf16.msrb.mxu0 %v1268_v8 }
  0x2e   :  { %226 = vmatpush.bf16.msrb.mxu1 %v1188_v30  ;;  %v1473_v30 = vld [vmem:[#allocation2 + $0xb4] sm:$0xf] }
  0x2f   :  { %517 = vmatpush.bf16.msrb.mxu2 %v1256_v16  ;;  %615 = vmatpush.bf16.msrb.mxu0 %v1260_v17  ;;  %v1316_v32 = vor.u32 %v1473_v30, %v1313_v31  ;;  %v1312_v16 = vor.u32 %v1474_v15, %v1311_v14  ;;  %v1488_v14 = vld [vmem:[%s2012_s5 + $0x28] sm:$0xff] }
  0x30   :  { %v1496_v15 = vld [vmem:[%s2012_s5 + $0x68] sm:$0xff] }
  0x31   :  { %1206 = vmatmul.msk.bf16.gmra.mxu0 %vm138_vm1, %v83_v35  ;;  %1208 = vmatmul.msk.bf16.gmra.mxu1 %vm138_vm1, %v1786_v36 }
  0x32   :  { %661 = vmatpush.bf16.msra.mxu1 %v1348_v42  ;;  %1211 = vmatmul.msk.bf16.gmra.mxu2 %vm138_vm1, %v1820_v12 }
  0x33   :  { %518 = vmatpush.bf16.msrb.mxu2 %v1248_v21 }
  0x36   :  { %662 = vmatpush.bf16.msra.mxu1 %v1340_v45  ;;  %v1451_v45 = vld [vmem:[#allocation2 + $0x4] sm:$0xf] }
  0x37   :  { %519 = vmatpush.bf16.msrb.mxu2 %v1240_v27  ;;  %v1228_v48 = vor.u32 %v1451_v45, %v1225_v47  ;;  %v1470_v27 = vld [vmem:[#allocation2 + $0x94] sm:$0xf0]  ;;  %v1862_v47 = vperm.slane %v1841_v56, 1 }
  0x38   :  { %v1296_v28 = vor.u32 %v1470_v27, %v1295_v26 }
  0x3a   :  { %663 = vmatpush.bf16.msra.mxu1 %v1332_v49  ;;  %v1471_v49 = vld [vmem:[#allocation2 + $0xa4] sm:$0xf] }
  0x3b   :  { %520 = vmatpush.bf16.msrb.mxu2 %v1232_v37  ;;  %v1308_v51 = vor.u32 %v1471_v49, %v1305_v50 }
  0x3e   :  { %664 = vmatpush.bf16.msra.mxu1 %v1324_v3  ;;  %v1478_v3 = vld [vmem:[#allocation2 + $0xd4] sm:$0xf0] }
  0x3f   :  { %521 = vmatpush.bf16.msrb.mxu2 %v1224_v46  ;;  %v1328_v4 = vor.u32 %v1478_v3, %v1327_v2 }
  0x41   :  { %1209 = vmatmul.msk.bf16.gmra.mxu1 %vm138_vm1, %v1797_v39  ;;  %565 = vmatpush.bf16.msrb.mxu3 %v1328_v4 }
  0x42   :  { %665 = vmatpush.bf16.msra.mxu1 %v1316_v32 }
  0x45   :  { %566 = vmatpush.bf16.msrb.mxu3 %v1320_v11 }
  0x46   :  { %666 = vmatpush.bf16.msra.mxu1 %v1308_v51 }
  0x49   :  { %567 = vmatpush.bf16.msrb.mxu3 %v1312_v16 }
  0x4a   :  { %667 = vmatpush.bf16.msra.mxu1 %v1300_v0 }
  0x51   :  { %1213 = vmatmul.msk.bf16.vlgmr.msrb.gmra.mxu1 %vm138_vm1, %v82_v22  ;;  %v1249_v22 = vld [vmem:[#allocation2 + $0x38] sm:$0xf0] }
  0x61   :  { %1214 = vmatmul.msk.bf16.gmra.mxu1 %vm138_vm1, %v83_v35  ;;  %v1453_v35 = vld [vmem:[#allocation2 + $0x14] sm:$0xf] }
  0x62   :  { %v1236_v40 = vor.u32 %v1453_v35, %v1233_v38  ;;  %v1288_v35 = vor.u32 %v1468_v34, %v1287_v33 }
  0x71   :  { %1215 = vmatmul.msk.bf16.gmra.mxu1 %vm138_vm1, %v84_v23  ;;  %v1252_v23 = vor.u32 %v1457_v20, %v1249_v22  ;;  %v1472_v20 = vld [vmem:[#allocation2 + $0xa4] sm:$0xf0]  ;;  %v1467_v22 = vld [vmem:[#allocation2 + $0x84] sm:$0xf] }
  0x72   :  { %v1304_v21 = vor.u32 %v1472_v20, %v1303_v19 }
  0x73   :  { %616 = vmatpush.bf16.msrb.mxu0 %v1252_v23  ;;  %v1289_v23 = vld [vmem:[#allocation2 + $0x88] sm:$0xf0] }
  0x74   :  { %568 = vmatpush.bf16.msrb.mxu3 %v1304_v21  ;;  %v1292_v24 = vor.u32 %v1467_v22, %v1289_v23 }
  0x76   :  { %668 = vmatpush.bf16.msra.mxu1 %v1292_v24 }
  0x77   :  { %617 = vmatpush.bf16.msrb.mxu0 %v1244_v29 }
  0x78   :  { %569 = vmatpush.bf16.msrb.mxu3 %v1296_v28 }
  0x7b   :  { %618 = vmatpush.bf16.msrb.mxu0 %v1236_v40 }
  0x7c   :  { %570 = vmatpush.bf16.msrb.mxu3 %v1288_v35 }
  0x7f   :  { %619 = vmatpush.bf16.msrb.mxu0 %v1228_v48  ;;  %v1490_v48 = vld [vmem:[%s2012_s5 + $0x38] sm:$0xff] }
  0x80   :  { %890 = vmatpush.bf16.msra.mxu2 %v1490_v48  ;;  %v1494_v48 = vld [vmem:[%s2012_s5 + $0x58] sm:$0xff] }
  0x81   :  { %1216 = vmatmul.msk.bf16.gmra.mxu1 %vm138_vm1, %v1786_v36  ;;  %v81_v36 = vld [vmem:[%s2007_s0 + $0x78] sm:$0xff] }
  0x82   :  { %v1832_v42 = vpack.c.bf16 %v81_v36, %v80_v41 }
  0x84   :  { %1212 = vmatmul.msk.bf16.vlgmr.msra.gmra.mxu3 %vm138_vm1, %v1832_v42  ;;  %891 = vmatpush.bf16.msra.mxu2 %v1489_v62  ;;  %v1485_v62 = vld [vmem:[%s2012_s5 + $0x10] sm:$0xff] }
  0x88   :  { %892 = vmatpush.bf16.msra.mxu2 %v1488_v14 }
  0x91   :  { %1217 = vmatmul.msk.bf16.gmra.mxu1 %vm138_vm1, %v1797_v39  ;;  %v1846_v39 = vperm.slane %v1841_v56, 0 }
  0x9e   :  { %v179_v57 = vpop.f32.mrf.mxu0  ;;  %v1843_v58 = vpop.f32.mrf.mxu1 }
  0x9f   :  { %v180_v1 = vadd.f32 %v179_v57, %v1846_v39  ;;  %v190_v41 = vadd.f32 %v1843_v58, %v1846_v39 }
  0xa1   :  { %1218 = vmatmul.msk.bf16.gmra.mxu1 %vm138_vm1, %v1809_v53  ;;  %v268_v7 = vmax.f32 %v180_v1, 0.0  ;;  %v276_v44 = vmax.f32 %v190_v41, 0.0 }
  0xa5   :  { %v204_v9 = vpop.f32.mrf.mxu2 }
  0xa6   :  { %v181_v5 = vpop.f32.mrf.mxu0  ;;  %v191_v6 = vpop.f32.mrf.mxu1 }
  0xa7   :  { %v182_v8 = vadd.f32 %v181_v5, %v1846_v39  ;;  %v192_v40 = vadd.f32 %v191_v6, %v1846_v39 }
  0xa9   :  { %v270_v53 = vmax.f32 %v182_v8, 0.0  ;;  %v278_v43 = vmax.f32 %v192_v40, 0.0 }
  0xab   :  { %v300_v13 = vpack.c.bf16 %v270_v53, %v268_v7  ;;  %v304_v45 = vpack.c.bf16 %v278_v43, %v276_v44 }
  0xad   :  { %522 = vmatmul.bf16.vlgmr.msrb.gmra.mxu2 %v300_v13  ;;  %620 = vmatmul.bf16.vlgmr.msrb.gmra.mxu0 %v300_v13  ;;  %v205_v13 = vadd.f32 %v204_v9, %v1846_v39  ;;  %v206_v16 = vpop.f32.mrf.mxu2 }
  0xae   :  { %v184_v17 = vpop.f32.mrf.mxu0  ;;  %v194_v18 = vpop.f32.mrf.mxu1 }
  0xaf   :  { %v185_v25 = vadd.f32 %v184_v17, %v1846_v39  ;;  %v195_v50 = vadd.f32 %v194_v18, %v1846_v39  ;;  %v207_v17 = vadd.f32 %v206_v16, %v1846_v39  ;;  %v288_v19 = vmax.f32 %v205_v13, 0.0  ;;  %v1483_v16 = vld [vmem:[%s2012_s5] sm:$0xff] }
  0xb1   :  { %1219 = vmatmul.msk.bf16.gmra.mxu1 %vm138_vm1, %v1820_v12  ;;  %v272_v31 = vmax.f32 %v185_v25, 0.0  ;;  %v280_v56 = vmax.f32 %v195_v50, 0.0  ;;  %v290_v20 = vmax.f32 %v207_v17, 0.0 }
  0xb3   :  { %v310_v25 = vpack.c.bf16 %v290_v20, %v288_v19 }
  0xb5   :  { %v209_v26 = vpop.f32.mrf.mxu2 }
  0xb6   :  { %v186_v29 = vpop.f32.mrf.mxu0  ;;  %v196_v30 = vpop.f32.mrf.mxu1 }
  0xb7   :  { %v187_v32 = vadd.f32 %v186_v29, %v1846_v39  ;;  %v197_v49 = vadd.f32 %v196_v30, %v1846_v39  ;;  %v1487_v29 = vld [vmem:[%s2012_s5 + $0x20] sm:$0xff] }
  0xb8   :  { %v1495_v30 = vld [vmem:[%s2012_s5 + $0x60] sm:$0xff]  ;;  %893 = vmatpush.bf16.msra.mxu2 %v1487_v29 }
  0xb9   :  { %v274_v12 = vmax.f32 %v187_v32, 0.0  ;;  %v282_v54 = vmax.f32 %v197_v49, 0.0 }
  0xbb   :  { %v302_v37 = vpack.c.bf16 %v274_v12, %v272_v31  ;;  %v306_v59 = vpack.c.bf16 %v282_v54, %v280_v56  ;;  %v210_v31 = vadd.f32 %v209_v26, %v1846_v39 }
  0xbd   :  { %527 = vmatmul.bf16.gmra.mxu2 %v302_v37  ;;  %625 = vmatmul.bf16.gmra.mxu0 %v302_v37  ;;  %v211_v32 = vpop.f32.mrf.mxu2  ;;  %v292_v12 = vmax.f32 %v210_v31, 0.0 }
  0xbe   :  { %v199_v38 = vpop.f32.mrf.mxu1  ;;  %v212_v33 = vadd.f32 %v211_v32, %v1846_v39 }
  0xbf   :  { %v200_v1 = vadd.f32 %v199_v38, %v1846_v39 }
  0xc0   :  { %v294_v37 = vmax.f32 %v212_v33, 0.0 }
  0xc1   :  { %1220 = vmatmul.msk.bf16.gmra.mxu1 %vm138_vm1, %v1832_v42  ;;  %v1498_v42 = vld [vmem:[%s2012_s5 + $0x78] sm:$0xff]  ;;  %v284_v6 = vmax.f32 %v200_v1, 0.0 }
  0xc2   :  { %939 = vmatpush.bf16.msra.mxu3 %v1498_v42 }
  0xc6   :  { %v201_v36 = vpop.f32.mrf.mxu1  ;;  %940 = vmatpush.bf16.msra.mxu3 %v1497_v63 }
  0xc7   :  { %v202_v0 = vadd.f32 %v201_v36, %v1846_v39  ;;  %v312_v36 = vpack.c.bf16 %v294_v37, %v292_v12 }
  0xc9   :  { %v286_v4 = vmax.f32 %v202_v0, 0.0 }
  0xca   :  { %941 = vmatpush.bf16.msra.mxu3 %v1496_v15 }
  0xcb   :  { %v308_v10 = vpack.c.bf16 %v286_v4, %v284_v6  ;;  %v1484_v6 = vld [vmem:[%s2012_s5 + $0x8] sm:$0xff] }
  0xcd   :  { %532 = vmatmul.bf16.gmra.mxu2 %v304_v45  ;;  %630 = vmatmul.bf16.gmra.mxu0 %v304_v45 }
  0xce   :  { %v228_v46 = vpop.f32.mrf.mxu1  ;;  %942 = vmatpush.bf16.msra.mxu3 %v1495_v30  ;;  %v348_v30 = vld [vmem:[%s2011_s4] sm:$0x3] }
  0xcf   :  { %v229_v51 = vadd.f32 %v228_v46, %v1862_v47  ;;  %v1486_v46 = vld [vmem:[%s2012_s5 + $0x18] sm:$0xff]  ;;  %v1941_v32 = vperm.slane %v348_v30, 1  ;;  %v1945_v37 = vperm.slane %v348_v30, 0  ;;  %v1504_v30 = vld [vmem:[#allocation5 + $0x28] sm:$0xff] }
  0xd0   :  { %894 = vmatpush.bf16.msra.mxu2 %v1486_v46 }
  0xd1   :  { %v269_v57 = vmax.f32 %v229_v51, 0.0 }
  0xd2   :  { %943 = vmatpush.bf16.msra.mxu3 %v1494_v48 }
  0xd4   :  { %895 = vmatpush.bf16.msra.mxu2 %v1485_v62 }
  0xd6   :  { %v230_v52 = vpop.f32.mrf.mxu1 }
  0xd7   :  { %v231_v55 = vadd.f32 %v230_v52, %v1862_v47 }
  0xd8   :  { %896 = vmatpush.bf16.msra.mxu2 %v1484_v6 }
  0xd9   :  { %v271_v58 = vmax.f32 %v231_v55, 0.0 }
  0xdb   :  { %v301_v60 = vpack.c.bf16 %v271_v58, %v269_v57 }
  0xdc   :  { %897 = vmatpush.bf16.msra.mxu2 %v1483_v16 }
  0xdd   :  { %537 = vmatmul.bf16.gmra.mxu2 %v306_v59  ;;  %571 = vmatmul.bf16.vlgmr.msrb.gmra.mxu3 %v301_v60 }
  0xde   :  { %635 = vmatmul.bf16.gmra.mxu0 %v306_v59  ;;  %669 = vmatmul.bf16.vlgmr.msra.gmra.mxu1 %v301_v60  ;;  %v233_v61 = vpop.f32.mrf.mxu1 }
  0xdf   :  { %v234_v2 = vadd.f32 %v233_v61, %v1862_v47 }
  0xe1   :  { %v273_v7 = vmax.f32 %v234_v2, 0.0 }
  0xe6   :  { %v235_v3 = vpop.f32.mrf.mxu1 }
  0xe7   :  { %v236_v5 = vadd.f32 %v235_v3, %v1862_v47 }
  0xe9   :  { %v275_v8 = vmax.f32 %v236_v5, 0.0 }
  0xeb   :  { %v303_v11 = vpack.c.bf16 %v275_v8, %v273_v7  ;;  %v1492_v7 = vld [vmem:[%s2012_s5 + $0x48] sm:$0xff] }
  0xed   :  { %542 = vmatmul.bf16.gmra.mxu2 %v308_v10  ;;  %576 = vmatmul.bf16.gmra.mxu3 %v303_v11 }
  0xee   :  { %640 = vmatmul.bf16.gmra.mxu0 %v308_v10  ;;  %674 = vmatmul.bf16.gmra.mxu1 %v303_v11  ;;  %v238_v53 = vpop.f32.mrf.mxu1 }
  0xef   :  { %v239_v18 = vadd.f32 %v238_v53, %v1862_v47 }
  0xf1   :  { %v277_v23 = vmax.f32 %v239_v18, 0.0  ;;  %v1491_v18 = vld [vmem:[%s2012_s5 + $0x40] sm:$0xff] }
  0xf6   :  { %v240_v21 = vpop.f32.mrf.mxu1 }
  0xf7   :  { %v241_v22 = vadd.f32 %v240_v21, %v1862_v47 }
  0xf9   :  { %v279_v24 = vmax.f32 %v241_v22, 0.0 }
  0xfb   :  { %v305_v27 = vpack.c.bf16 %v279_v24, %v277_v23 }
  0xfd   :  { %581 = vmatmul.bf16.gmra.mxu3 %v305_v27  ;;  %547 = vmatmul.bf16.gmra.mxu2 %v310_v25 }
  0xfe   :  { %679 = vmatmul.bf16.gmra.mxu1 %v305_v27  ;;  %v243_v28 = vpop.f32.mrf.mxu1  ;;  %645 = vmatmul.bf16.gmra.mxu0 %v310_v25 }
  0xff   :  { %v244_v34 = vadd.f32 %v243_v28, %v1862_v47 }
 0x101   :  { %v281_v40 = vmax.f32 %v244_v34, 0.0 }
 0x106   :  { %v245_v35 = vpop.f32.mrf.mxu1 }
 0x107   :  { %v246_v38 = vadd.f32 %v245_v35, %v1862_v47  ;;  %v214_v44 = vpop.f32.mrf.mxu3 }
 0x108   :  { %v215_v42 = vadd.f32 %v214_v44, %v1846_v39 }
 0x109   :  { %v283_v41 = vmax.f32 %v246_v38, 0.0 }
 0x10a   :  { %v296_v54 = vmax.f32 %v215_v42, 0.0 }
 0x10b   :  { %v307_v43 = vpack.c.bf16 %v283_v41, %v281_v40 }
 0x10d   :  { %586 = vmatmul.bf16.gmra.mxu3 %v307_v43  ;;  %552 = vmatmul.bf16.gmra.mxu2 %v312_v36 }
 0x10e   :  { %684 = vmatmul.bf16.gmra.mxu1 %v307_v43  ;;  %v248_v45 = vpop.f32.mrf.mxu1  ;;  %650 = vmatmul.bf16.gmra.mxu0 %v312_v36 }
 0x10f   :  { %v216_v49 = vpop.f32.mrf.mxu3  ;;  %v249_v50 = vadd.f32 %v248_v45, %v1862_v47  ;;  %v1506_v45 = vld [vmem:[#allocation5 + $0x38] sm:$0xff] }
 0x110   :  { %v217_v51 = vadd.f32 %v216_v49, %v1846_v39  ;;  %v1493_v39 = vld [vmem:[%s2012_s5 + $0x50] sm:$0xff]  ;;  %1080 = vmatpush.bf16.msra.mxu0 %v1506_v45 }
 0x111   :  { %v285_v57 = vmax.f32 %v249_v50, 0.0  ;;  %944 = vmatpush.bf16.msra.mxu3 %v1493_v39 }
 0x112   :  { %v298_v56 = vmax.f32 %v217_v51, 0.0 }
 0x114   :  { %v314_v59 = vpack.c.bf16 %v298_v56, %v296_v54 }
 0x115   :  { %945 = vmatpush.bf16.msra.mxu3 %v1492_v7 }
 0x116   :  { %v250_v52 = vpop.f32.mrf.mxu1 }
 0x117   :  { %v251_v55 = vadd.f32 %v250_v52, %v1862_v47 }
 0x119   :  { %v287_v58 = vmax.f32 %v251_v55, 0.0  ;;  %946 = vmatpush.bf16.msra.mxu3 %v1491_v18 }
 0x11b   :  { %v309_v60 = vpack.c.bf16 %v287_v58, %v285_v57 }
 0x11d   :  { %591 = vmatmul.bf16.gmra.mxu3 %v309_v60  ;;  %557 = vmatmul.bf16.gmra.mxu2 %v314_v59 }
 0x11e   :  { %689 = vmatmul.bf16.gmra.mxu1 %v309_v60  ;;  %v253_v61 = vpop.f32.mrf.mxu1  ;;  %655 = vmatmul.bf16.gmra.mxu0 %v314_v59 }
 0x11f   :  { %v254_v63 = vadd.f32 %v253_v61, %v1862_v47 }
 0x121   :  { %v289_v2 = vmax.f32 %v254_v63, 0.0 }
 0x126   :  { %v255_v0 = vpop.f32.mrf.mxu1 }
 0x127   :  { %v256_v1 = vadd.f32 %v255_v0, %v1862_v47 }
 0x129   :  { %v291_v3 = vmax.f32 %v256_v1, 0.0 }
 0x12a   :  { %v621_v13 = vpop.f32.mrf.mxu0 }
 0x12b   :  { %v311_v4 = vpack.c.bf16 %v291_v3, %v289_v2  ;;  %v622_v34 = vadd.f32 %v621_v13, %v1941_v32 }
 0x12d   :  { %596 = vmatmul.bf16.gmra.mxu3 %v311_v4 }
 0x12e   :  { %694 = vmatmul.bf16.gmra.mxu1 %v311_v4  ;;  %v258_v5 = vpop.f32.mrf.mxu1 }
 0x12f   :  { %v259_v8 = vadd.f32 %v258_v5, %v1862_v47 }
 0x130   :  { %v523_v17 = vpop.f32.mrf.mxu2 }
 0x131   :  { %v293_v11 = vmax.f32 %v259_v8, 0.0  ;;  %v524_v36 = vadd.f32 %v523_v17, %v1945_v37  ;;  %v1505_v8 = vld [vmem:[#allocation5 + $0x30] sm:$0xff] }
 0x132   :  { %v623_v19 = vpop.f32.mrf.mxu0  ;;  %1081 = vmatpush.bf16.msra.mxu0 %v1505_v8 }
 0x133   :  { %v624_v35 = vadd.f32 %v623_v19, %v1941_v32 }
 0x136   :  { %v260_v9 = vpop.f32.mrf.mxu1  ;;  %1082 = vmatpush.bf16.msra.mxu0 %v1504_v30 }
 0x137   :  { %v261_v10 = vadd.f32 %v260_v9, %v1862_v47 }
 0x138   :  { %v525_v25 = vpop.f32.mrf.mxu2 }
 0x139   :  { %v295_v53 = vmax.f32 %v261_v10, 0.0  ;;  %v526_v46 = vadd.f32 %v525_v25, %v1945_v37 }
 0x13a   :  { %v626_v27 = vpop.f32.mrf.mxu0 }
 0x13b   :  { %v313_v14 = vpack.c.bf16 %v295_v53, %v293_v11  ;;  %v627_v58 = vadd.f32 %v626_v27, %v1941_v32 }
 0x13d   :  { %601 = vmatmul.bf16.gmra.mxu3 %v313_v14 }
 0x13e   :  { %699 = vmatmul.bf16.gmra.mxu1 %v313_v14  ;;  %v263_v15 = vpop.f32.mrf.mxu1 }
 0x13f   :  { %v264_v20 = vadd.f32 %v263_v15, %v1862_v47 }
 0x140   :  { %v528_v28 = vpop.f32.mrf.mxu2 }
 0x141   :  { %v297_v23 = vmax.f32 %v264_v20, 0.0  ;;  %v529_v0 = vadd.f32 %v528_v28, %v1945_v37 }
 0x142   :  { %v628_v29 = vpop.f32.mrf.mxu0 }
 0x143   :  { %v629_v60 = vadd.f32 %v628_v29, %v1941_v32 }
 0x146   :  { %v265_v21 = vpop.f32.mrf.mxu1 }
 0x147   :  { %v266_v22 = vadd.f32 %v265_v21, %v1862_v47 }
 0x148   :  { %v530_v33 = vpop.f32.mrf.mxu2 }
 0x149   :  { %v299_v24 = vmax.f32 %v266_v22, 0.0  ;;  %v531_v3 = vadd.f32 %v530_v33, %v1945_v37 }
 0x14a   :  { %v631_v38 = vpop.f32.mrf.mxu0 }
 0x14b   :  { %v315_v26 = vpack.c.bf16 %v299_v24, %v297_v23  ;;  %v632_v15 = vadd.f32 %v631_v38, %v1941_v32 }
 0x14d   :  { %606 = vmatmul.bf16.gmra.mxu3 %v315_v26 }
 0x14e   :  { %704 = vmatmul.bf16.gmra.mxu1 %v315_v26 }
 0x150   :  { %v533_v42 = vpop.f32.mrf.mxu2 }
 0x151   :  { %v534_v22 = vadd.f32 %v533_v42, %v1945_v37 }
 0x152   :  { %v633_v56 = vpop.f32.mrf.mxu0 }
 0x153   :  { %v634_v18 = vadd.f32 %v633_v56, %v1941_v32 }
 0x158   :  { %v535_v61 = vpop.f32.mrf.mxu2 }
 0x159   :  { %v536_v26 = vadd.f32 %v535_v61, %v1945_v37 }
 0x15b   :  { %v670_v31 = vpop.f32.mrf.mxu1  ;;  %v636_v4 = vpop.f32.mrf.mxu0 }
 0x15c   :  { %v671_v12 = vadd.f32 %v670_v31, %v622_v34  ;;  %v637_v38 = vadd.f32 %v636_v4, %v1941_v32 }
 0x15e   :  { %v711_v43 = vmax.f32 %v671_v12, 0.0 }
 0x160   :  { %v572_v47 = vpop.f32.mrf.mxu3  ;;  %v538_v13 = vpop.f32.mrf.mxu2 }
 0x161   :  { %v573_v48 = vadd.f32 %v572_v47, %v524_v36 }
 0x163   :  { %v672_v40 = vpop.f32.mrf.mxu1  ;;  %v710_v52 = vmax.f32 %v573_v48, 0.0  ;;  %v638_v17 = vpop.f32.mrf.mxu0 }
 0x164   :  { %v673_v41 = vadd.f32 %v672_v40, %v624_v35  ;;  %v639_v36 = vadd.f32 %v638_v17, %v1941_v32 }
 0x166   :  { %v713_v44 = vmax.f32 %v673_v41, 0.0 }
 0x168   :  { %v743_v49 = vpack.c.bf16 %v713_v44, %v711_v43  ;;  %v574_v50 = vpop.f32.mrf.mxu3  ;;  %v540_v23 = vpop.f32.mrf.mxu2 }
 0x169   :  { %v575_v51 = vadd.f32 %v574_v50, %v526_v46  ;;  %v539_v46 = vadd.f32 %v538_v13, %v1945_v37  ;;  %v541_v50 = vadd.f32 %v540_v23, %v1945_v37  ;;  %v1502_v13 = vld [vmem:[#allocation5 + $0x18] sm:$0xff] }
 0x16a   :  { %947 = vmatmul.bf16.vlgmr.msra.gmra.mxu3 %v743_v49 }
 0x16b   :  { %v712_v54 = vmax.f32 %v575_v51, 0.0  ;;  %v675_v55 = vpop.f32.mrf.mxu1  ;;  %v641_v33 = vpop.f32.mrf.mxu0 }
 0x16c   :  { %v676_v62 = vadd.f32 %v675_v55, %v627_v58  ;;  %v1503_v55 = vld [vmem:[#allocation5 + $0x20] sm:$0xff] }
 0x16d   :  { %v742_v57 = vpack.c.bf16 %v712_v54, %v710_v52  ;;  %1083 = vmatpush.bf16.msra.mxu0 %v1503_v55 }
 0x16e   :  { %v715_v1 = vmax.f32 %v676_v62, 0.0 }
 0x16f   :  { %898 = vmatmul.bf16.vlgmr.msra.gmra.mxu2 %v742_v57 }
 0x170   :  { %v577_v59 = vpop.f32.mrf.mxu3  ;;  %v543_v40 = vpop.f32.mrf.mxu2 }
 0x171   :  { %v578_v5 = vadd.f32 %v577_v59, %v529_v0  ;;  %1084 = vmatpush.bf16.msra.mxu0 %v1502_v13 }
 0x173   :  { %v677_v39 = vpop.f32.mrf.mxu1  ;;  %v714_v10 = vmax.f32 %v578_v5, 0.0  ;;  %v643_v48 = vpop.f32.mrf.mxu0  ;;  %v544_v5 = vadd.f32 %v543_v40, %v1945_v37 }
 0x174   :  { %v678_v63 = vadd.f32 %v677_v39, %v629_v60  ;;  %v642_v39 = vadd.f32 %v641_v33, %v1941_v32  ;;  %v644_v0 = vadd.f32 %v643_v48, %v1941_v32 }
 0x176   :  { %v717_v2 = vmax.f32 %v678_v63, 0.0 }
 0x178   :  { %v579_v6 = vpop.f32.mrf.mxu3  ;;  %v745_v7 = vpack.c.bf16 %v717_v2, %v715_v1  ;;  %v545_v57 = vpop.f32.mrf.mxu2 }
 0x179   :  { %v580_v9 = vadd.f32 %v579_v6, %v531_v3  ;;  %v546_v8 = vadd.f32 %v545_v57, %v1945_v37 }
 0x17a   :  { %952 = vmatmul.bf16.gmra.mxu3 %v745_v7 }
 0x17b   :  { %v716_v11 = vmax.f32 %v580_v9, 0.0  ;;  %v680_v53 = vpop.f32.mrf.mxu1  ;;  %v646_v61 = vpop.f32.mrf.mxu0 }
 0x17c   :  { %v681_v19 = vadd.f32 %v680_v53, %v632_v15 }
 0x17d   :  { %v744_v14 = vpack.c.bf16 %v716_v11, %v714_v10 }
 0x17e   :  { %v719_v24 = vmax.f32 %v681_v19, 0.0 }
 0x17f   :  { %903 = vmatmul.bf16.gmra.mxu2 %v744_v14 }
 0x180   :  { %v582_v16 = vpop.f32.mrf.mxu3  ;;  %v548_v2 = vpop.f32.mrf.mxu2 }
 0x181   :  { %v583_v27 = vadd.f32 %v582_v16, %v534_v22 }
 0x183   :  { %v682_v20 = vpop.f32.mrf.mxu1  ;;  %v718_v34 = vmax.f32 %v583_v27, 0.0  ;;  %v648_v10 = vpop.f32.mrf.mxu0  ;;  %v549_v27 = vadd.f32 %v548_v2, %v1945_v37 }
 0x184   :  { %v683_v21 = vadd.f32 %v682_v20, %v634_v18  ;;  %v647_v20 = vadd.f32 %v646_v61, %v1941_v32  ;;  %v649_v23 = vadd.f32 %v648_v10, %v1941_v32 }
 0x186   :  { %v721_v25 = vmax.f32 %v683_v21, 0.0 }
 0x188   :  { %v584_v28 = vpop.f32.mrf.mxu3  ;;  %v747_v29 = vpack.c.bf16 %v721_v25, %v719_v24  ;;  %v550_v18 = vpop.f32.mrf.mxu2 }
 0x189   :  { %v585_v31 = vadd.f32 %v584_v28, %v536_v26 }
 0x18a   :  { %957 = vmatmul.bf16.gmra.mxu3 %v747_v29 }
 0x18b   :  { %v720_v47 = vmax.f32 %v585_v31, 0.0  ;;  %v685_v35 = vpop.f32.mrf.mxu1  ;;  %v651_v22 = vpop.f32.mrf.mxu0  ;;  %v551_v31 = vadd.f32 %v550_v18, %v1945_v37 }
 0x18c   :  { %v686_v43 = vadd.f32 %v685_v35, %v637_v38  ;;  %v1501_v35 = vld [vmem:[#allocation5 + $0x10] sm:$0xff] }
 0x18d   :  { %v746_v12 = vpack.c.bf16 %v720_v47, %v718_v34  ;;  %1085 = vmatpush.bf16.msra.mxu0 %v1501_v35 }
 0x18e   :  { %v723_v42 = vmax.f32 %v686_v43, 0.0 }
 0x18f   :  { %908 = vmatmul.bf16.gmra.mxu2 %v746_v12 }
 0x190   :  { %v587_v41 = vpop.f32.mrf.mxu3  ;;  %v553_v29 = vpop.f32.mrf.mxu2 }
 0x191   :  { %v588_v51 = vadd.f32 %v587_v41, %v539_v46 }
 0x193   :  { %v687_v44 = vpop.f32.mrf.mxu1  ;;  %v722_v58 = vmax.f32 %v588_v51, 0.0  ;;  %v653_v40 = vpop.f32.mrf.mxu0 }
 0x194   :  { %v688_v45 = vadd.f32 %v687_v44, %v639_v36  ;;  %v1500_v44 = vld [vmem:[#allocation5 + $0x8] sm:$0xff] }
 0x195   :  { %1086 = vmatpush.bf16.msra.mxu0 %v1500_v44 }
 0x196   :  { %v725_v49 = vmax.f32 %v688_v45, 0.0  ;;  %v652_v45 = vadd.f32 %v651_v22, %v1941_v32 }
 0x198   :  { %v749_v52 = vpack.c.bf16 %v725_v49, %v723_v42  ;;  %v589_v54 = vpop.f32.mrf.mxu3  ;;  %v555_v46 = vpop.f32.mrf.mxu2  ;;  %v654_v42 = vadd.f32 %v653_v40, %v1941_v32 }
 0x199   :  { %v590_v56 = vadd.f32 %v589_v54, %v541_v50  ;;  %v556_v57 = vadd.f32 %v555_v46, %v1945_v37 }
 0x19a   :  { %962 = vmatmul.bf16.gmra.mxu3 %v749_v52  ;;  %v554_v52 = vadd.f32 %v553_v29, %v1945_v37 }
 0x19b   :  { %v724_v59 = vmax.f32 %v590_v56, 0.0  ;;  %v690_v60 = vpop.f32.mrf.mxu1  ;;  %v656_v54 = vpop.f32.mrf.mxu0 }
 0x19c   :  { %v691_v1 = vadd.f32 %v690_v60, %v642_v39 }
 0x19d   :  { %v748_v62 = vpack.c.bf16 %v724_v59, %v722_v58 }
 0x19e   :  { %v727_v6 = vmax.f32 %v691_v1, 0.0 }
 0x19f   :  { %913 = vmatmul.bf16.gmra.mxu2 %v748_v62 }
 0x1a0   :  { %v592_v63 = vpop.f32.mrf.mxu3  ;;  %v558_v62 = vpop.f32.mrf.mxu2 }
 0x1a1   :  { %v593_v9 = vadd.f32 %v592_v63, %v544_v5  ;;  %v559_v10 = vadd.f32 %v558_v62, %v1945_v37 }
 0x1a3   :  { %v692_v3 = vpop.f32.mrf.mxu1  ;;  %v726_v15 = vmax.f32 %v593_v9, 0.0  ;;  %v658_v2 = vpop.f32.mrf.mxu0 }
 0x1a4   :  { %v693_v4 = vadd.f32 %v692_v3, %v644_v0  ;;  %v657_v3 = vadd.f32 %v656_v54, %v1941_v32  ;;  %v659_v5 = vadd.f32 %v658_v2, %v1941_v32 }
 0x1a6   :  { %v729_v7 = vmax.f32 %v693_v4, 0.0 }
 0x1a8   :  { %v751_v11 = vpack.c.bf16 %v729_v7, %v727_v6  ;;  %v594_v53 = vpop.f32.mrf.mxu3 }
 0x1a9   :  { %v595_v14 = vadd.f32 %v594_v53, %v546_v8  ;;  %v560_v8 = vpop.f32.mrf.mxu2 }
 0x1aa   :  { %967 = vmatmul.bf16.gmra.mxu3 %v751_v11  ;;  %v561_v13 = vadd.f32 %v560_v8, %v1945_v37 }
 0x1ab   :  { %v728_v16 = vmax.f32 %v595_v14, 0.0  ;;  %v695_v17 = vpop.f32.mrf.mxu1 }
 0x1ac   :  { %v696_v24 = vadd.f32 %v695_v17, %v647_v20 }
 0x1ad   :  { %v750_v19 = vpack.c.bf16 %v728_v16, %v726_v15  ;;  %v1499_v15 = vld [vmem:[#allocation5] sm:$0xff] }
 0x1ae   :  { %v731_v28 = vmax.f32 %v696_v24, 0.0  ;;  %1087 = vmatpush.bf16.msra.mxu0 %v1499_v15 }
 0x1af   :  { %918 = vmatmul.bf16.gmra.mxu2 %v750_v19 }
 0x1b0   :  { %v597_v21 = vpop.f32.mrf.mxu3 }
 0x1b1   :  { %v598_v33 = vadd.f32 %v597_v21, %v549_v27 }
 0x1b3   :  { %v697_v25 = vpop.f32.mrf.mxu1  ;;  %v730_v38 = vmax.f32 %v598_v33, 0.0 }
 0x1b4   :  { %v698_v26 = vadd.f32 %v697_v25, %v649_v23  ;;  %v1980_v23 = vld [vmem:[%s2013_s6] ss:$0 sm:$0xff] }
 0x1b6   :  { %v733_v30 = vmax.f32 %v698_v26, 0.0 }
 0x1b8   :  { %v753_v34 = vpack.c.bf16 %v733_v30, %v731_v28  ;;  %v599_v47 = vpop.f32.mrf.mxu3 }
 0x1b9   :  { %v600_v12 = vadd.f32 %v599_v47, %v551_v31 }
 0x1ba   :  { %972 = vmatmul.bf16.gmra.mxu3 %v753_v34 }
 0x1bb   :  { %v732_v41 = vmax.f32 %v600_v12, 0.0  ;;  %v700_v36 = vpop.f32.mrf.mxu1 }
 0x1bc   :  { %v701_v49 = vadd.f32 %v700_v36, %v652_v45 }
 0x1bd   :  { %v752_v43 = vpack.c.bf16 %v732_v41, %v730_v38 }
 0x1be   :  { %v735_v55 = vmax.f32 %v701_v49, 0.0 }
 0x1bf   :  { %923 = vmatmul.bf16.gmra.mxu2 %v752_v43 }
 0x1c0   :  { %v602_v48 = vpop.f32.mrf.mxu3 }
 0x1c1   :  { %v603_v58 = vadd.f32 %v602_v48, %v554_v52 }
 0x1c3   :  { %v702_v50 = vpop.f32.mrf.mxu1  ;;  %v734_v39 = vmax.f32 %v603_v58, 0.0 }
 0x1c4   :  { %v703_v51 = vadd.f32 %v702_v50, %v654_v42 }
 0x1c6   :  { %v737_v56 = vmax.f32 %v703_v51, 0.0 }
 0x1c8   :  { %v755_v59 = vpack.c.bf16 %v737_v56, %v735_v55  ;;  %v604_v60 = vpop.f32.mrf.mxu3 }
 0x1c9   :  { %v605_v61 = vadd.f32 %v604_v60, %v556_v57 }
 0x1ca   :  { %977 = vmatmul.bf16.gmra.mxu3 %v755_v59 }
 0x1cb   :  { %v736_v63 = vmax.f32 %v605_v61, 0.0  ;;  %v705_v0 = vpop.f32.mrf.mxu1 }
 0x1cc   :  { %v706_v6 = vadd.f32 %v705_v0, %v657_v3 }
 0x1cd   :  { %v754_v1 = vpack.c.bf16 %v736_v63, %v734_v39 }
 0x1ce   :  { %v739_v11 = vmax.f32 %v706_v6, 0.0 }
 0x1cf   :  { %928 = vmatmul.bf16.gmra.mxu2 %v754_v1 }
 0x1d0   :  { %v607_v4 = vpop.f32.mrf.mxu3 }
 0x1d1   :  { %v608_v14 = vadd.f32 %v607_v4, %v559_v10 }
 0x1d3   :  { %v707_v7 = vpop.f32.mrf.mxu1  ;;  %v738_v19 = vmax.f32 %v608_v14, 0.0 }
 0x1d4   :  { %v708_v9 = vadd.f32 %v707_v7, %v659_v5 }
 0x1d6   :  { %v741_v53 = vmax.f32 %v708_v9, 0.0 }
 0x1d8   :  { %v757_v16 = vpack.c.bf16 %v741_v53, %v739_v11  ;;  %v609_v17 = vpop.f32.mrf.mxu3 }
 0x1d9   :  { %v610_v18 = vadd.f32 %v609_v17, %v561_v13 }
 0x1da   :  { %982 = vmatmul.bf16.gmra.mxu3 %v757_v16 }
 0x1db   :  { %v740_v20 = vmax.f32 %v610_v18, 0.0 }
 0x1dd   :  { %v756_v32 = vpack.c.bf16 %v740_v20, %v738_v19 }
 0x1df   :  { %933 = vmatmul.bf16.gmra.mxu2 %v756_v32 }
 0x1ed   :  { %v948_v21 = vpop.f32.mrf.mxu3 }
 0x1f2   :  { %v899_v22 = vpop.f32.mrf.mxu2 }
 0x1f3   :  { %v900_v37 = vadd.f32 %v1980_v23, %v899_v22 }
 0x1f5   :  { %v950_v24 = vpop.f32.mrf.mxu3  ;;  %v949_v26 = vadd.f32 %v948_v21, %v900_v37 }
 0x1f7   :  { %v988_v30 = vmax.f32 %v949_v26, 0.0 }
 0x1fa   :  { %v901_v25 = vpop.f32.mrf.mxu2 }
 0x1fb   :  { %v902_v27 = vadd.f32 %v1980_v23, %v901_v25 }
 0x1fd   :  { %v951_v28 = vadd.f32 %v950_v24, %v902_v27  ;;  %v953_v29 = vpop.f32.mrf.mxu3 }
 0x1ff   :  { %v989_v31 = vmax.f32 %v951_v28, 0.0 }
 0x201   :  { %v1004_v33 = vpack.c.bf16 %v989_v31, %v988_v30 }
 0x202   :  { %v904_v34 = vpop.f32.mrf.mxu2 }
 0x203   :  { %1088 = vmatmul.bf16.vlgmr.msra.gmra.mxu0 %v1004_v33  ;;  %v905_v35 = vadd.f32 %v1980_v23, %v904_v34 }
 0x205   :  { %v955_v47 = vpop.f32.mrf.mxu3  ;;  %v954_v38 = vadd.f32 %v953_v29, %v905_v35 }
 0x207   :  { %v990_v43 = vmax.f32 %v954_v38, 0.0 }
 0x20a   :  { %v906_v12 = vpop.f32.mrf.mxu2 }
 0x20b   :  { %v907_v40 = vadd.f32 %v1980_v23, %v906_v12 }
 0x20d   :  { %v956_v41 = vadd.f32 %v955_v47, %v907_v40  ;;  %v958_v36 = vpop.f32.mrf.mxu3 }
 0x20f   :  { %v991_v44 = vmax.f32 %v956_v41, 0.0 }
 0x211   :  { %v1005_v45 = vpack.c.bf16 %v991_v44, %v990_v43 }
 0x212   :  { %v909_v46 = vpop.f32.mrf.mxu2 }
 0x213   :  { %1093 = vmatmul.bf16.gmra.mxu0 %v1005_v45  ;;  %v910_v42 = vadd.f32 %v1980_v23, %v909_v46 }
 0x215   :  { %v960_v48 = vpop.f32.mrf.mxu3  ;;  %v959_v50 = vadd.f32 %v958_v36, %v910_v42 }
 0x217   :  { %v992_v55 = vmax.f32 %v959_v50, 0.0 }
 0x21a   :  { %v911_v49 = vpop.f32.mrf.mxu2 }
 0x21b   :  { %v912_v51 = vadd.f32 %v1980_v23, %v911_v49  ;;  %v1574_v49 = vld [vmem:[%s2015_s8] ss:$0 sm:$0xff]  ;;  %s1659_s8 = smov [#allocation7]  }
 0x21c   :  { %s1165_s25 = sshll.u32 %s1659_s8, 4  ;;  %s1166_s25 = int_to_ptr.vmem [resolvable:$true] %s1165_s25 }
 0x21d   :  { %v961_v52 = vadd.f32 %v960_v48, %v912_v51  ;;  %v963_v54 = vpop.f32.mrf.mxu3 }
 0x21f   :  { %v993_v56 = vmax.f32 %v961_v52, 0.0 }
 0x221   :  { %v1006_v57 = vpack.c.bf16 %v993_v56, %v992_v55 }
 0x222   :  { %v914_v58 = vpop.f32.mrf.mxu2 }
 0x223   :  { %1098 = vmatmul.bf16.gmra.mxu0 %v1006_v57  ;;  %v915_v60 = vadd.f32 %v1980_v23, %v914_v58 }
 0x225   :  { %v965_v59 = vpop.f32.mrf.mxu3  ;;  %v964_v62 = vadd.f32 %v963_v54, %v915_v60 }
 0x227   :  { %v994_v1 = vmax.f32 %v964_v62, 0.0 }
 0x22a   :  { %v916_v61 = vpop.f32.mrf.mxu2 }
 0x22b   :  { %v917_v39 = vadd.f32 %v1980_v23, %v916_v61 }
 0x22d   :  { %v966_v63 = vadd.f32 %v965_v59, %v917_v39  ;;  %v968_v0 = vpop.f32.mrf.mxu3 }
 0x22f   :  { %v995_v2 = vmax.f32 %v966_v63, 0.0 }
 0x231   :  { %v1007_v3 = vpack.c.bf16 %v995_v2, %v994_v1 }
 0x232   :  { %v919_v4 = vpop.f32.mrf.mxu2 }
 0x233   :  { %1103 = vmatmul.bf16.gmra.mxu0 %v1007_v3  ;;  %v920_v6 = vadd.f32 %v1980_v23, %v919_v4 }
 0x235   :  { %v970_v5 = vpop.f32.mrf.mxu3  ;;  %v969_v8 = vadd.f32 %v968_v0, %v920_v6 }
 0x237   :  { %v996_v53 = vmax.f32 %v969_v8, 0.0 }
 0x23a   :  { %v921_v7 = vpop.f32.mrf.mxu2 }
 0x23b   :  { %v922_v9 = vadd.f32 %v1980_v23, %v921_v7 }
 0x23d   :  { %v971_v10 = vadd.f32 %v970_v5, %v922_v9  ;;  %v973_v11 = vpop.f32.mrf.mxu3 }
 0x23f   :  { %v997_v13 = vmax.f32 %v971_v10, 0.0 }
 0x241   :  { %v1008_v14 = vpack.c.bf16 %v997_v13, %v996_v53 }
 0x242   :  { %v924_v15 = vpop.f32.mrf.mxu2 }
 0x243   :  { %1108 = vmatmul.bf16.gmra.mxu0 %v1008_v14  ;;  %v925_v17 = vadd.f32 %v1980_v23, %v924_v15 }
 0x245   :  { %v975_v16 = vpop.f32.mrf.mxu3  ;;  %v974_v19 = vadd.f32 %v973_v11, %v925_v17 }
 0x247   :  { %v998_v22 = vmax.f32 %v974_v19, 0.0 }
 0x24a   :  { %v926_v18 = vpop.f32.mrf.mxu2 }
 0x24b   :  { %v927_v20 = vadd.f32 %v1980_v23, %v926_v18 }
 0x24d   :  { %v976_v32 = vadd.f32 %v975_v16, %v927_v20  ;;  %v978_v21 = vpop.f32.mrf.mxu3 }
 0x24f   :  { %v999_v24 = vmax.f32 %v976_v32, 0.0 }
 0x251   :  { %v1009_v37 = vpack.c.bf16 %v999_v24, %v998_v22 }
 0x252   :  { %v929_v25 = vpop.f32.mrf.mxu2 }
 0x253   :  { %1113 = vmatmul.bf16.gmra.mxu0 %v1009_v37  ;;  %v930_v26 = vadd.f32 %v1980_v23, %v929_v25 }
 0x255   :  { %v980_v27 = vpop.f32.mrf.mxu3  ;;  %v979_v29 = vadd.f32 %v978_v21, %v930_v26 }
 0x257   :  { %v1000_v33 = vmax.f32 %v979_v29, 0.0 }
 0x25a   :  { %v931_v28 = vpop.f32.mrf.mxu2 }
 0x25b   :  { %v932_v30 = vadd.f32 %v1980_v23, %v931_v28 }
 0x25d   :  { %v981_v31 = vadd.f32 %v980_v27, %v932_v30  ;;  %v983_v35 = vpop.f32.mrf.mxu3 }
 0x25f   :  { %v1001_v34 = vmax.f32 %v981_v31, 0.0 }
 0x261   :  { %v1010_v47 = vpack.c.bf16 %v1001_v34, %v1000_v33 }
 0x262   :  { %v934_v12 = vpop.f32.mrf.mxu2 }
 0x263   :  { %1118 = vmatmul.bf16.gmra.mxu0 %v1010_v47  ;;  %v935_v38 = vadd.f32 %v1980_v23, %v934_v12 }
 0x265   :  { %v984_v41 = vadd.f32 %v983_v35, %v935_v38  ;;  %v985_v43 = vpop.f32.mrf.mxu3 }
 0x267   :  { %v1002_v45 = vmax.f32 %v984_v41, 0.0 }
 0x26a   :  { %v936_v40 = vpop.f32.mrf.mxu2 }
 0x26b   :  { %v937_v36 = vadd.f32 %v1980_v23, %v936_v40 }
 0x26d   :  { %v986_v44 = vadd.f32 %v985_v43, %v937_v36 }
 0x26f   :  { %v1003_v46 = vmax.f32 %v986_v44, 0.0 }
 0x271   :  { %v1011_v48 = vpack.c.bf16 %v1003_v46, %v1002_v45 }
 0x273   :  { %1123 = vmatmul.bf16.gmra.mxu0 %v1011_v48 }
 0x280   :  { %v1089_v42 = vpop.f32.mrf.mxu0 }
 0x281   :  { %v1090_v51 = vadd.f32 %v1574_v49, %v1089_v42 }
 0x288   :  { %v1091_v50 = vpop.f32.mrf.mxu0 }
 0x289   :  { %v1092_v52 = vadd.f32 %v1574_v49, %v1091_v50 }
 0x28b   :  { %v1510_v54 = vpack.c.bf16 %v1092_v52, %v1090_v51 }
 0x28d   :  { %1511 = vst [vmem:[#allocation7] sm:$0xff] %v1510_v54  }
 0x290   :  { %v1094_v55 = vpop.f32.mrf.mxu0 }
 0x291   :  { %v1095_v57 = vadd.f32 %v1574_v49, %v1094_v55 }
 0x298   :  { %v1096_v56 = vpop.f32.mrf.mxu0 }
 0x299   :  { %v1097_v23 = vadd.f32 %v1574_v49, %v1096_v56 }
 0x29b   :  { %v1515_v58 = vpack.c.bf16 %v1097_v23, %v1095_v57 }
 0x29d   :  { %1547 = vst [vmem:[#allocation7 + $0x8] sm:$0xff] %v1515_v58  }
 0x2a0   :  { %v1099_v59 = vpop.f32.mrf.mxu0 }
 0x2a1   :  { %v1100_v61 = vadd.f32 %v1574_v49, %v1099_v59 }
 0x2a8   :  { %v1101_v60 = vpop.f32.mrf.mxu0 }
 0x2a9   :  { %v1102_v62 = vadd.f32 %v1574_v49, %v1101_v60 }
 0x2ab   :  { %v1520_v39 = vpack.c.bf16 %v1102_v62, %v1100_v61 }
 0x2ad   :  { %1548 = vst [vmem:[#allocation7 + $0x10] sm:$0xff] %v1520_v39  }
 0x2b0   :  { %v1104_v63 = vpop.f32.mrf.mxu0 }
 0x2b1   :  { %v1105_v1 = vadd.f32 %v1574_v49, %v1104_v63 }
 0x2b8   :  { %v1106_v0 = vpop.f32.mrf.mxu0 }
 0x2b9   :  { %v1107_v2 = vadd.f32 %v1574_v49, %v1106_v0 }
 0x2bb   :  { %v1525_v3 = vpack.c.bf16 %v1107_v2, %v1105_v1 }
 0x2bd   :  { %1549 = vst [vmem:[#allocation7 + $0x18] sm:$0xff] %v1525_v3  }
 0x2c0   :  { %v1109_v4 = vpop.f32.mrf.mxu0 }
 0x2c1   :  { %v1110_v6 = vadd.f32 %v1574_v49, %v1109_v4 }
 0x2c8   :  { %v1111_v5 = vpop.f32.mrf.mxu0 }
 0x2c9   :  { %v1112_v7 = vadd.f32 %v1574_v49, %v1111_v5 }
 0x2cb   :  { %v1530_v8 = vpack.c.bf16 %v1112_v7, %v1110_v6 }
 0x2cd   :  { %1550 = vst [vmem:[#allocation7 + $0x20] sm:$0xff] %v1530_v8  }
 0x2d0   :  { %v1114_v9 = vpop.f32.mrf.mxu0 }
 0x2d1   :  { %v1115_v11 = vadd.f32 %v1574_v49, %v1114_v9 }
 0x2d8   :  { %v1116_v10 = vpop.f32.mrf.mxu0 }
 0x2d9   :  { %v1117_v53 = vadd.f32 %v1574_v49, %v1116_v10 }
 0x2db   :  { %v1535_v13 = vpack.c.bf16 %v1117_v53, %v1115_v11 }
 0x2dd   :  { %1551 = vst [vmem:[#allocation7 + $0x28] sm:$0xff] %v1535_v13  }
 0x2e0   :  { %v1119_v14 = vpop.f32.mrf.mxu0 }
 0x2e1   :  { %v1120_v16 = vadd.f32 %v1574_v49, %v1119_v14 }
 0x2e8   :  { %v1121_v15 = vpop.f32.mrf.mxu0 }
 0x2e9   :  { %v1122_v17 = vadd.f32 %v1574_v49, %v1121_v15 }
 0x2eb   :  { %v1540_v18 = vpack.c.bf16 %v1122_v17, %v1120_v16 }
 0x2ed   :  { %1552 = vst [vmem:[#allocation7 + $0x30] sm:$0xff] %v1540_v18  }
 0x2f0   :  { %v1124_v19 = vpop.f32.mrf.mxu0 }
 0x2f1   :  { %v1125_v32 = vadd.f32 %v1574_v49, %v1124_v19 }
 0x2f8   :  { %v1126_v20 = vpop.f32.mrf.mxu0 }
 0x2f9   :  { %v1127_v21 = vadd.f32 %v1574_v49, %v1126_v20 }
 0x2fb   :  { %v1545_v22 = vpack.c.bf16 %v1127_v21, %v1125_v32 }
 0x2fd   :  { %1553 = vst [vmem:[#allocation7 + $0x38] sm:$0xff] %v1545_v22  }
 0x2fe   :  { %1173 = dma.vmem_to_hbm [thread:$0]  %s1166_s25, 1024, %s1168_s28, [#allocation4], %s1657_s21, %s1657_s21, %s1658_s22  }
 0x2ff   :  { %1651 = dma.done.wait [#allocation4], 1024  }
 0x300   :  { %1652 = vsyncadd [#allocation4], 4294966272 }
 0x301   :  { %1178 = vsyncpa [#allocation3], 1 }
 0x302   :  { %1179 = vsyncpa [#allocation6], 1 }
 0x303   :  { %1180 = vsyncpa [#allocation4], 1 }

</bundles_post_ra>
